<compile_context>
chip_gen: v7x
topology: tpu7x:2x2x1
jax: 0.10.0
libtpu: 0.0.40
codegen_flags: <defaults>
</compile_context>

<pallas_src>
import jax
import jax.numpy as jnp
from jax.experimental import pallas as pl
from jax.experimental.pallas import tpu as pltpu


def _round_up(x, m):
    return (x + m - 1) // m * m


def _mlp_kernel(x_ref, w1_ref, b1_ref, w2_ref, b2_ref, o_ref):
    # fc1: (tb, dim_a) @ (dim_a, h_pad) -> f32, + bias, ReLU
    h = jnp.dot(x_ref[...], w1_ref[...], preferred_element_type=jnp.float32)
    h = jnp.maximum(h + b1_ref[...], 0.0)
    # fc2: (tb, h_pad) @ (h_pad, num_c) -> f32, + bias  (unpadded num_c output)
    y = jnp.dot(h, w2_ref[...], preferred_element_type=jnp.float32)
    o_ref[...] = (y + b2_ref[...]).astype(o_ref.dtype)


def prepare_params(w1, b1, w2, b2):
    """Pad weights/biases once (call outside the hot loop / close over result).

    w1: (dim_a, 20), b1: (20,), w2: (20, num_c), b2: (num_c,)  -- all f32,
    w1/w2 already transposed vs torch's fc.weight.
    Hidden is padded to a multiple of 32 (sublane alignment only); padding is
    mathematically inert (zero weights + ReLU(0) = 0, zero fc2 rows).
    """
    dim_a, hidden = w1.shape
    num_c = w2.shape[1]
    h_pad = _round_up(hidden, 32)

    w1_p = jnp.zeros((dim_a, h_pad), jnp.float32).at[:, :hidden].set(
        w1.astype(jnp.float32))
    b1_p = jnp.zeros((1, h_pad), jnp.float32).at[:, :hidden].set(
        b1.astype(jnp.float32))
    w2_p = jnp.zeros((h_pad, num_c), jnp.float32).at[:hidden, :].set(
        w2.astype(jnp.float32))
    b2_p = b2.astype(jnp.float32).reshape(1, num_c)
    return w1_p, b1_p, w2_p, b2_p


def h_net_cross_entropy(x, params, *, tile_b=8192):
    """Forward pass of H_Net_CrossEntropy.

    x:      (B, dim_a) float32
    params: output of prepare_params()
    returns (B, num_c) float32 logits
    """
    w1_p, b1_p, w2_p, b2_p = params
    B, dim_a = x.shape
    h_pad = w1_p.shape[1]
    num_c = w2_p.shape[1]

    # Batch tile: multiple of 8 (f32 sublane), capped by tile_b and the batch.
    tb = min(tile_b, _round_up(B, 8))
    # Keep >= 2 grid steps when the batch is big enough (v7x megacore sharding).
    if pl.cdiv(B, tb) < 2 and B >= 16:
        tb = _round_up(pl.cdiv(B, 2), 8)
    grid = (pl.cdiv(B, tb),)

    flops = 2 * B * (dim_a * h_pad + h_pad * num_c)
    bytes_accessed = (B * dim_a * 4 + B * num_c * 4
                      + (w1_p.size + b1_p.size + w2_p.size + b2_p.size) * 4)

    out = pl.pallas_call(
        _mlp_kernel,
        out_shape=jax.ShapeDtypeStruct((B, num_c), jnp.float32),
        grid=grid,
        in_specs=[
            pl.BlockSpec((tb, dim_a), lambda i: (i, 0)),      # x: streamed per tile
            pl.BlockSpec((dim_a, h_pad), lambda i: (0, 0)),   # w1: VMEM-resident
            pl.BlockSpec((1, h_pad), lambda i: (0, 0)),       # b1: VMEM-resident
            pl.BlockSpec((h_pad, num_c), lambda i: (0, 0)),   # w2: VMEM-resident
            pl.BlockSpec((1, num_c), lambda i: (0, 0)),       # b2: VMEM-resident
        ],
        out_specs=pl.BlockSpec((tb, num_c), lambda i: (i, 0)),
        compiler_params=pltpu.CompilerParams(
            dimension_semantics=("parallel",),
            vmem_limit_bytes=40 * 1024 * 1024,
        ),
        cost_estimate=pl.CostEstimate(
            flops=flops, bytes_accessed=bytes_accessed, transcendentals=0),
    )(x, w1_p, b1_p, w2_p, b2_p)

    return out  # already (B, num_c); no slice pass needed


def init_params(key, dim_a, num_c):
    """Deterministic init mimicking nn.Linear default (uniform +-1/sqrt(fan_in))."""
    k1, k2, k3, k4 = jax.random.split(key, 4)
    bound1 = 1.0 / jnp.sqrt(jnp.float32(dim_a))
    w1 = jax.random.uniform(k1, (dim_a, 20), jnp.float32, -bound1, bound1)
    b1 = jax.random.uniform(k2, (20,), jnp.float32, -bound1, bound1)
    bound2 = 1.0 / jnp.sqrt(jnp.float32(20))
    w2 = jax.random.uniform(k3, (20, num_c), jnp.float32, -bound2, bound2)
    b2 = jax.random.uniform(k4, (num_c,), jnp.float32, -bound2, bound2)
    return w1, b1, w2, b2


if __name__ == "__main__":
    dim_a = 32      # input feature dim
    num_c = 10      # number of classes
    batch = 8

    key = jax.random.PRNGKey(0)
    kx, kp = jax.random.split(key)
    x = jax.random.normal(kx, (batch, dim_a), jnp.float32)
    w1, b1, w2, b2 = init_params(kp, dim_a, num_c)

    params = prepare_params(w1, b1, w2, b2)   # padded/cast once, reused per call
    out = h_net_cross_entropy(x, params)
    out = jax.block_until_ready(out)

    # Reference check in plain JAX (same math as the PyTorch module), f32.
    ref = jnp.maximum(x @ w1 + b1, 0.0) @ w2 + b2
    assert out.shape == (batch, num_c)
    # All-f32 operands; small slack only for MXU accumulation-order differences.
    assert jnp.allclose(out, ref, atol=2e-2, rtol=2e-2), (
        float(jnp.max(jnp.abs(out - ref))))

    print("KERNEL_OK")
</pallas_src>

<mosaic_0001>
module attributes {stable_mosaic.version = 11 : i64} {
  func.func @_mlp_kernel(%arg0: i32, %arg1: memref<8x32xf32, #tpu.memory_space<vmem>>, %arg2: memref<32x32xf32, #tpu.memory_space<vmem>>, %arg3: memref<1x32xf32, #tpu.memory_space<vmem>>, %arg4: memref<32x10xf32, #tpu.memory_space<vmem>>, %arg5: memref<1x10xf32, #tpu.memory_space<vmem>>, %arg6: memref<8x10xf32, #tpu.memory_space<vmem>>) attributes {dimension_semantics = [#tpu.dimension_semantics<parallel>], iteration_bounds = array<i64: 1>, scalar_prefetch = 0 : i64, scratch_operands = 0 : i64, tpu.core_type = #tpu.core_type<tc>, window_params = [{transform_indices = @transform_0, window_bounds = array<i64: 8, 32>}, {pipeline_mode = #tpu.pipeline_mode<synchronous>, transform_indices = @transform_1, window_bounds = array<i64: 32, 32>}, {pipeline_mode = #tpu.pipeline_mode<synchronous>, transform_indices = @transform_2, window_bounds = array<i64: 1, 32>}, {pipeline_mode = #tpu.pipeline_mode<synchronous>, transform_indices = @transform_3, window_bounds = array<i64: 32, 10>}, {pipeline_mode = #tpu.pipeline_mode<synchronous>, transform_indices = @transform_4, window_bounds = array<i64: 1, 10>}, {transform_indices = @transform_5, window_bounds = array<i64: 8, 10>}]} {
    %c0 = arith.constant 0 : index
    %c0_0 = arith.constant 0 : index
    %0 = vector.load %arg1[%c0, %c0_0] : memref<8x32xf32, #tpu.memory_space<vmem>>, vector<8x32xf32>
    %c0_1 = arith.constant 0 : index
    %c0_2 = arith.constant 0 : index
    %1 = vector.load %arg2[%c0_1, %c0_2] : memref<32x32xf32, #tpu.memory_space<vmem>>, vector<32x32xf32>
    %cst = arith.constant dense<0.000000e+00> : vector<8x32xf32>
    %2 = tpu.matmul %0, %1, %cst {dimension_numbers = #tpu.dot_dimension_numbers<[1], [0], [0], [1], [0, 0, 1, 1], [], []>} : vector<8x32xf32>, vector<32x32xf32>, vector<8x32xf32> -> vector<8x32xf32>
    %c0_3 = arith.constant 0 : index
    %c0_4 = arith.constant 0 : index
    %3 = vector.load %arg3[%c0_3, %c0_4] : memref<1x32xf32, #tpu.memory_space<vmem>>, vector<1x32xf32>
    %4 = vector.broadcast %3 : vector<1x32xf32> to vector<8x32xf32>
    %5 = arith.addf %2, %4 : vector<8x32xf32>
    %cst_5 = arith.constant 0.000000e+00 : f32
    %6 = vector.broadcast %cst_5 : f32 to vector<8x32xf32>
    %7 = arith.maximumf %5, %6 : vector<8x32xf32>
    %c0_6 = arith.constant 0 : index
    %c0_7 = arith.constant 0 : index
    %8 = vector.load %arg4[%c0_6, %c0_7] : memref<32x10xf32, #tpu.memory_space<vmem>>, vector<32x10xf32>
    %cst_8 = arith.constant dense<0.000000e+00> : vector<8x10xf32>
    %9 = tpu.matmul %7, %8, %cst_8 {dimension_numbers = #tpu.dot_dimension_numbers<[1], [0], [0], [1], [0, 0, 1, 1], [], []>} : vector<8x32xf32>, vector<32x10xf32>, vector<8x10xf32> -> vector<8x10xf32>
    %c0_9 = arith.constant 0 : index
    %c0_10 = arith.constant 0 : index
    %10 = vector.load %arg5[%c0_9, %c0_10] : memref<1x10xf32, #tpu.memory_space<vmem>>, vector<1x10xf32>
    %11 = vector.broadcast %10 : vector<1x10xf32> to vector<8x10xf32>
    %12 = arith.addf %9, %11 : vector<8x10xf32>
    %c0_11 = arith.constant 0 : index
    %c0_12 = arith.constant 0 : index
    %13 = vector.load %arg6[%c0_11, %c0_12] : memref<8x10xf32, #tpu.memory_space<vmem>>, vector<8x10xf32>
    tpu.vector_store %arg6[%c0_11, %c0_12], %12 {strides = array<i32>} : memref<8x10xf32, #tpu.memory_space<vmem>>, vector<8x10xf32>,
    return
  }
  func.func @transform_0(%arg0: i32) -> (i32, i32) {
    %c0_i32 = arith.constant 0 : i32
    %c0_i32_0 = arith.constant 0 : i32
    return %arg0, %c0_i32 : i32, i32
  }
  func.func @transform_1(%arg0: i32) -> (i32, i32) {
    %c0_i32 = arith.constant 0 : i32
    %c0_i32_0 = arith.constant 0 : i32
    %c0_i32_1 = arith.constant 0 : i32
    return %c0_i32, %c0_i32_0 : i32, i32
  }
  func.func @transform_2(%arg0: i32) -> (i32, i32) {
    %c0_i32 = arith.constant 0 : i32
    %c0_i32_0 = arith.constant 0 : i32
    %c0_i32_1 = arith.constant 0 : i32
    return %c0_i32, %c0_i32_0 : i32, i32
  }
  func.func @transform_3(%arg0: i32) -> (i32, i32) {
    %c0_i32 = arith.constant 0 : i32
    %c0_i32_0 = arith.constant 0 : i32
    %c0_i32_1 = arith.constant 0 : i32
    return %c0_i32, %c0_i32_0 : i32, i32
  }
  func.func @transform_4(%arg0: i32) -> (i32, i32) {
    %c0_i32 = arith.constant 0 : i32
    %c0_i32_0 = arith.constant 0 : i32
    %c0_i32_1 = arith.constant 0 : i32
    return %c0_i32, %c0_i32_0 : i32, i32
  }
  func.func @transform_5(%arg0: i32) -> (i32, i32) {
    %c0_i32 = arith.constant 0 : i32
    %c0_i32_0 = arith.constant 0 : i32
    return %arg0, %c0_i32 : i32, i32
  }
}

</mosaic_0001>

<bundles_post_ra>
// kernel: tpu_custom_call.1
= control target key start
LH: loop header
LB: loop body
LE: loop exit
PB: predicated region body
PF: predicated region fallthrough
CT: control target
= control target key end

     0   :  { %v284_v3 = vmov 0.0|0.0   ;;  %vm285_vm0 = vmmov 0   ;;  %v286_v6 = vmov 0.0   ;;  %s363_s0 = inlined_call_operand.vmem [shape: f32[8,32], index: 0, kind: input, shape index: {}]   ;;  %s364_s1 = inlined_call_operand.vmem [shape: f32[32,32], index: 1, kind: input, shape index: {}]   ;;  %s365_s2 = inlined_call_operand.vmem [shape: f32[1,32], index: 2, kind: input, shape index: {}]   ;;  %s366_s3 = inlined_call_operand.vmem [shape: f32[32,10], index: 3, kind: input, shape index: {}]   ;;  %s367_s4 = inlined_call_operand.vmem [shape: f32[1,10], index: 4, kind: input, shape index: {}]   ;;  %s368_s5 = inlined_call_operand.hbm [shape: f32[8,10], index: 5, kind: output, shape index: {}]  }
   0x1   :  { %v22_v0 = vld [vmem:[%s364_s1] sm:$0xff]  ;;  %v23_v1 = vld [vmem:[%s364_s1 + $0x8] sm:$0xff]  ;;  %v24_v2 = vld [vmem:[%s364_s1 + $0x10] sm:$0xff]  ;;  %244 = vmatprep.subr.bf16.mxu0 %v284_v3  ;;  %230 = vmatprep.mubr.msk.f32.mxu0 %vm285_vm0, %v286_v6 }
   0x2   :  { %v245_v4 = vpack.c.bf16 %v23_v1, %v22_v0  ;;  %v25_v5 = vld [vmem:[%s364_s1 + $0x18] sm:$0xff]  ;;  %v108_v7 = vld [vmem:[%s366_s3] sm:$0xff]  ;;  %250 = vmatprep.subr.bf16.mxu1 %v284_v3  ;;  %v109_v8 = vld [vmem:[%s366_s3 + $0x8] sm:$0xff]  ;;  %241 = vmatprep.mubr.msk.f32.mxu1 %vm285_vm0, %v286_v6 }
   0x3   :  { %10 = vsyncpa [#allocation3], 0  ;;  %v248_v9 = vpack.c.bf16 %v25_v5, %v24_v2  ;;  %v251_v10 = vpack.c.bf16 %v109_v8, %v108_v7  ;;  %v21_v11 = vld [vmem:[%s363_s0] sm:$0xff]  ;;  %vm33_vm1 = vcmask 261120   ;;  %v110_v12 = vld [vmem:[%s366_s3 + $0x10] sm:$0xff]  ;;  %s287_s13 = smov [#allocation2]  }
   0x4   :  { %246 = vmatpush3.bf16.msra.mxu0 %v245_v4  ;;  %v111_v13 = vld [vmem:[%s366_s3 + $0x18] sm:$0xff]  ;;  %v208_v15 = vld [vmem:[%s365_s2] ss:$0 sm:$0xff]  ;;  %s200_s14 = sshll.u32 %s287_s13, 4  ;;  %vm192_vm2 = vcmask 80896   ;;  %s201_s14 = int_to_ptr.vmem [resolvable:$true] %s200_s14 }
   0x5   :  { %247 = vmatprep.subr.bf16.mxu0 %v284_v3  ;;  %252 = vmatpush3.bf16.msra.mxu1 %v251_v10  ;;  %v254_v14 = vpack.c.bf16 %v111_v13, %v110_v12  ;;  %v210_v20 = vld [vmem:[%s367_s4] ss:$0 sm:$0xff]  ;;  %s260_s3 = scalar_lea.vmem %s201_s14, 128  ;;  %p265_p1 = scmp.lt.s32.totalorder %s201_s14, %s201_s14 }
   0x6   :  { %253 = vmatprep.subr.bf16.mxu1 %v284_v3  ;;  %p261_p0 = scmp.ne.s32.totalorder %s201_s14, %s260_s3  ;;  %p266_p2 = scmp.lt.s32.totalorder %s260_s3, %s260_s3 }
   0x8   :  { %249 = vmatpush3.bf16.msra.mxu0 %v248_v9  ;;  %p267_p3 = por %p266_p2, %p265_p1 }
   0x9   :  { %255 = vmatpush3.bf16.msra.mxu1 %v254_v14 }
   0xa   :  { %p268_p4 = pnand %p267_p3, %p261_p0 }
   0xb   :  { %231 = vmatmul.mubr.msk.f32.vlgmr.msra.gmra.mrb[0].mxu0 %vm33_vm1, %v21_v11 }
  0xde   :  { %v103_v16 = vpop.f32.mrb[0].mxu0 }
  0xdf   :  { %v104_v17 = vadd.f32 %v208_v15, %v103_v16  ;;  %v232_v18 = vpop.f32.mrb[1].mxu0 }
  0xe1   :  { %v107_v19 = vmax.f32 %v104_v17, 0.0 }
  0xe3   :  { %242 = vmatmul.mubr.msk.f32.vlgmr.msra.gmra.mrb[0].mxu1 %vm33_vm1, %v107_v19 }
 0x1b6   :  { %v188_v21 = vpop.f32.mrb[0].mxu1 }
 0x1b7   :  { %v189_v22 = vadd.f32 %v210_v20, %v188_v21  ;;  %v243_v23 = vpop.f32.mrb[1].mxu1 }
 0x1b9   :  { %193 = vst.msk [vmem:[#allocation2] sm:$0xff] %vm192_vm2, %v189_v22 }
 0x1ba   :  { %271 = shalt.err (!%p268_p4)
}
 0x1bb   :  { %s272_s16 = scalar_lea.hbm %s368_s5, 128 }
 0x1bc   :  { %p273_p5 = scmp.ne.s32.totalorder %s368_s5, %s272_s16  ;;  %p276_p6 = scmp.lt.u32.totalorder %s272_s16, %s368_s5 }
 0x1be   :  { %p278_p7 = pnand %p276_p6, %p273_p5 }
 0x1c0   :  { %281 = shalt.err (!%p278_p7)
}
 0x1c1   :  { %203 = dma.vmem_to_hbm [thread:$0]  %s201_s14, 128, %s368_s5, [#allocation3]  }
 0x1c2   :  { %282 = dma.done.wait [#allocation3], 128  }
 0x1c3   :  { %283 = vsyncadd [#allocation3], 4294967168 }
 0x1c4   :  { %207 = vsyncpa [#allocation3], 1 }

</bundles_post_ra>
